<compile_context>
chip_gen: v5e
topology: v5e:2x2
jax: 0.10.0
libtpu: 0.0.40
codegen_flags: <defaults>
</compile_context>

<pallas_src>
import math
from functools import partial

import jax
import jax.numpy as jnp
from jax.experimental import pallas as pl
from jax.experimental.pallas import tpu as pltpu


# ----------------------------------------------------------------------------
# Fused kernel: one batch element per grid step
# ----------------------------------------------------------------------------

def _cross_layer_kernel(x1_ref, x2_ref, mask_ref,
                        g1_ref, b1_ref, g2_ref, b2_ref,
                        wq_ref, wkv_ref, wt_ref, bt_ref,
                        g3_ref, b3_ref,
                        w1_ref, bf1_ref, w2_ref, bf2_ref,
                        o_ref, *, n_head, d_head, has_tail):
    f32 = jnp.float32
    x1 = x1_ref[0].astype(f32)            # (T, D)
    x2 = x2_ref[0].astype(f32)            # (T, D)
    keep = mask_ref[0].astype(f32) > 0.0  # (1, T)  key mask, broadcasts over queries

    def ln(x, g_ref, b_ref):
        mu = jnp.mean(x, axis=-1, keepdims=True)
        var = jnp.mean((x - mu) ** 2, axis=-1, keepdims=True)
        return ((x - mu) * jax.lax.rsqrt(var + 1e-5)
                * g_ref[...].astype(f32) + b_ref[...].astype(f32))

    # ---- pre-LN of both streams ----
    x1n = ln(x1, g1_ref, b1_ref)
    x2n = ln(x2, g2_ref, b2_ref)

    # ---- projections (fused Q, fused KV) ----
    q = jnp.dot(x1n, wq_ref[...].astype(f32), preferred_element_type=f32)    # (T, d_cat)
    kv = jnp.dot(x2n, wkv_ref[...].astype(f32), preferred_element_type=f32)  # (T, 2*d_cat)
    d_cat = n_head * d_head
    k = kv[:, :d_cat]
    v = kv[:, d_cat:]
    wt = wt_ref[...].astype(f32) if has_tail else None                        # (d_cat, D)

    # ---- multi-head cross attention; tail folded per head (no concat) ----
    scale = d_head ** -0.5
    attn_out = None
    for h in range(n_head):
        sl = slice(h * d_head, (h + 1) * d_head)
        qh, kh, vh = q[:, sl], k[:, sl], v[:, sl]
        dots = jax.lax.dot_general(qh, kh, (((1,), (1,)), ((), ())),
                                   preferred_element_type=f32) * scale        # (T, T)
        dots = jnp.where(keep, dots, -1e30)       # finite fill: no inf-inf NaN
        mx = jnp.max(dots, axis=-1, keepdims=True)
        e = jnp.exp(dots - mx)
        denom = jnp.sum(e, axis=-1, keepdims=True)
        p = e * pl.reciprocal(denom, approx=True)
        oh = jnp.dot(p, vh, preferred_element_type=f32)                        # (T, d_head)
        contrib = (jnp.dot(oh, wt[sl, :], preferred_element_type=f32)
                   if has_tail else oh)
        attn_out = contrib if attn_out is None else attn_out + contrib
    if has_tail:
        attn_out = attn_out + bt_ref[...].astype(f32)

    # ---- x = cross_attn(...); z = LN2(x); out = FF(z) + x  (matches PyTorch) ----
    x = attn_out
    z = ln(x, g3_ref, b3_ref)
    h1 = jnp.dot(z, w1_ref[...].astype(f32), preferred_element_type=f32) + bf1_ref[...].astype(f32)
    c = math.sqrt(2.0 / math.pi)                  # GELU (tanh approx) — see TODO above
    h1 = 0.5 * h1 * (1.0 + jnp.tanh(c * (h1 + 0.044715 * h1 * h1 * h1)))
    ff = jnp.dot(h1, w2_ref[...].astype(f32), preferred_element_type=f32) + bf2_ref[...].astype(f32)
    o_ref[0] = (ff + x).astype(o_ref.dtype)


def cross_transformer_layer(params, x1, x2, mask=None, *, n_head, d_head):
    """x1, x2: (B, T, d_model); mask: (B, T) (1 = keep key, 0 = mask) or None."""
    B, T, D = x1.shape
    d_cat = n_head * d_head
    if mask is None:
        mask = jnp.ones((B, T), jnp.float32)
    mask3 = mask.reshape(B, 1, T).astype(jnp.float32)

    has_tail = params["tail_w"] is not None
    wt = params["tail_w"] if has_tail else jnp.zeros((d_cat, D), jnp.float32)
    bt = params["tail_b"] if has_tail else jnp.zeros((D,), jnp.float32)
    row = lambda a: a.reshape(1, -1)

    batched = lambda shape: pl.BlockSpec((1,) + shape, lambda i: (i, 0, 0))
    shared = lambda shape: pl.BlockSpec(shape, lambda i: (0, 0))

    H = params["ff_w1"].shape[1]
    in_specs = [
        batched((T, D)),          # x1
        batched((T, D)),          # x2
        batched((1, T)),          # mask
        shared((1, D)), shared((1, D)),      # ln1_x1 g,b
        shared((1, D)), shared((1, D)),      # ln1_x2 g,b
        shared((D, d_cat)),                  # Wq
        shared((D, 2 * d_cat)),              # Wkv
        shared((d_cat, D)), shared((1, D)),  # tail W,b
        shared((1, D)), shared((1, D)),      # ln2 g,b
        shared((D, H)), shared((1, H)),      # ff fc1 W,b
        shared((H, D)), shared((1, D)),      # ff fc2 W,b
    ]

    return pl.pallas_call(
        partial(_cross_layer_kernel, n_head=n_head, d_head=d_head, has_tail=has_tail),
        out_shape=jax.ShapeDtypeStruct((B, T, D), x1.dtype),
        grid=(B,),
        in_specs=in_specs,
        out_specs=batched((T, D)),
        compiler_params=pltpu.CompilerParams(dimension_semantics=("parallel",)),
    )(x1, x2, mask3,
      row(params["ln1_x1_g"]), row(params["ln1_x1_b"]),
      row(params["ln1_x2_g"]), row(params["ln1_x2_b"]),
      params["wq"], params["wkv"], wt, row(bt),
      row(params["ln2_g"]), row(params["ln2_b"]),
      params["ff_w1"], row(params["ff_b1"]),
      params["ff_w2"], row(params["ff_b2"]))


# ----------------------------------------------------------------------------
# Parameter init (deterministic synthetic, PyTorch-style layouts as (in, out))
# ----------------------------------------------------------------------------

def _linear_w(key, d_in, d_out):
    limit = math.sqrt(6.0 / (d_in + d_out))
    return jax.random.uniform(key, (d_in, d_out), jnp.float32, -limit, limit)


def init_cross_layer(key, d_model, d_head, n_head, hd_mlp):
    d_cat = d_head * n_head
    ks = jax.random.split(key, 5)
    has_tail = (n_head != 1) or (d_cat != d_model)
    return {
        "ln1_x1_g": jnp.ones((d_model,), jnp.float32),
        "ln1_x1_b": jnp.zeros((d_model,), jnp.float32),
        "ln1_x2_g": jnp.ones((d_model,), jnp.float32),
        "ln1_x2_b": jnp.zeros((d_model,), jnp.float32),
        "wq": _linear_w(ks[0], d_model, d_cat),
        "wkv": _linear_w(ks[1], d_model, 2 * d_cat),
        "tail_w": _linear_w(ks[2], d_cat, d_model) if has_tail else None,
        "tail_b": jnp.zeros((d_model,), jnp.float32) if has_tail else None,
        "ln2_g": jnp.ones((d_model,), jnp.float32),
        "ln2_b": jnp.zeros((d_model,), jnp.float32),
        "ff_w1": _linear_w(ks[3], d_model, hd_mlp),
        "ff_b1": jnp.zeros((hd_mlp,), jnp.float32),
        "ff_w2": _linear_w(ks[4], hd_mlp, d_model),
        "ff_b2": jnp.zeros((d_model,), jnp.float32),
    }


# ----------------------------------------------------------------------------
# Pure-JAX reference (for a loose sanity check)
# ----------------------------------------------------------------------------

def reference_cross_layer(p, x1, x2, mask, *, n_head, d_head):
    def ln(x, g, b):
        mu = x.mean(-1, keepdims=True)
        var = ((x - mu) ** 2).mean(-1, keepdims=True)
        return (x - mu) / jnp.sqrt(var + 1e-5) * g + b

    x1n = ln(x1, p["ln1_x1_g"], p["ln1_x1_b"])
    x2n = ln(x2, p["ln1_x2_g"], p["ln1_x2_b"])
    q = x1n @ p["wq"]
    kv = x2n @ p["wkv"]
    d_cat = n_head * d_head
    k, v = kv[..., :d_cat], kv[..., d_cat:]
    B, T, _ = q.shape
    qh = q.reshape(B, T, n_head, d_head).transpose(0, 2, 1, 3)
    kh = k.reshape(B, T, n_head, d_head).transpose(0, 2, 1, 3)
    vh = v.reshape(B, T, n_head, d_head).transpose(0, 2, 1, 3)
    dots = jnp.einsum("bhqd,bhkd->bhqk", qh, kh) * d_head ** -0.5
    dots = jnp.where(mask[:, None, None, :] > 0, dots, -1e30)
    prob = jax.nn.softmax(dots, axis=-1)
    o = jnp.einsum("bhqk,bhkd->bhqd", prob, vh).transpose(0, 2, 1, 3).reshape(B, T, d_cat)
    if p["tail_w"] is not None:
        o = o @ p["tail_w"] + p["tail_b"]
    z = ln(o, p["ln2_g"], p["ln2_b"])
    h = z @ p["ff_w1"] + p["ff_b1"]
    c = math.sqrt(2.0 / math.pi)
    h = 0.5 * h * (1.0 + jnp.tanh(c * (h + 0.044715 * h ** 3)))
    return h @ p["ff_w2"] + p["ff_b2"] + o


# ----------------------------------------------------------------------------
# Main
# ----------------------------------------------------------------------------

if __name__ == "__main__":
    B, T = 2, 8
    D_MODEL, D_HEAD, N_HEAD = 32, 16, 2
    HD_MLP = 2 * D_MODEL

    key = jax.random.PRNGKey(0)
    k_param, k_x1, k_x2 = jax.random.split(key, 3)
    params = init_cross_layer(k_param, D_MODEL, D_HEAD, N_HEAD, HD_MLP)

    x1 = jax.random.normal(k_x1, (B, T, D_MODEL), jnp.float32)
    x2 = jax.random.normal(k_x2, (B, T, D_MODEL), jnp.float32)
    video_len = jnp.array([8, 5], dtype=jnp.int32)
    mask = (jnp.arange(T)[None, :] < video_len[:, None]).astype(jnp.float32)   # (B, T)

    out = cross_transformer_layer(params, x1, x2, mask, n_head=N_HEAD, d_head=D_HEAD)
    out = jax.block_until_ready(out)

    assert out.shape == (B, T, D_MODEL), out.shape
    assert bool(jnp.all(jnp.isfinite(out)))

    ref = reference_cross_layer(params, x1, x2, mask, n_head=N_HEAD, d_head=D_HEAD)
    # loose tolerance: pl.reciprocal(approx=True) in the softmax is not bit-exact
    assert bool(jnp.all(jnp.abs(out - ref) < 2e-2)), float(jnp.max(jnp.abs(out - ref)))

    print("KERNEL_OK")
</pallas_src>

<mosaic_0001>
module attributes {stable_mosaic.version = 11 : i64} {
  func.func @_cross_layer_kernel(%arg0: i32, %arg1: memref<1x8x32xf32, #tpu.memory_space<vmem>>, %arg2: memref<1x8x32xf32, #tpu.memory_space<vmem>>, %arg3: memref<1x1x8xf32, #tpu.memory_space<vmem>>, %arg4: memref<1x32xf32, #tpu.memory_space<vmem>>, %arg5: memref<1x32xf32, #tpu.memory_space<vmem>>, %arg6: memref<1x32xf32, #tpu.memory_space<vmem>>, %arg7: memref<1x32xf32, #tpu.memory_space<vmem>>, %arg8: memref<32x32xf32, #tpu.memory_space<vmem>>, %arg9: memref<32x64xf32, #tpu.memory_space<vmem>>, %arg10: memref<32x32xf32, #tpu.memory_space<vmem>>, %arg11: memref<1x32xf32, #tpu.memory_space<vmem>>, %arg12: memref<1x32xf32, #tpu.memory_space<vmem>>, %arg13: memref<1x32xf32, #tpu.memory_space<vmem>>, %arg14: memref<32x64xf32, #tpu.memory_space<vmem>>, %arg15: memref<1x64xf32, #tpu.memory_space<vmem>>, %arg16: memref<64x32xf32, #tpu.memory_space<vmem>>, %arg17: memref<1x32xf32, #tpu.memory_space<vmem>>, %arg18: memref<1x8x32xf32, #tpu.memory_space<vmem>>) attributes {dimension_semantics = [#tpu.dimension_semantics<parallel>], iteration_bounds = array<i64: 2>, scalar_prefetch = 0 : i64, scratch_operands = 0 : i64, tpu.core_type = #tpu.core_type<tc>, window_params = [{transform_indices = @transform_0, window_bounds = array<i64: 1, 8, 32>}, {transform_indices = @transform_1, window_bounds = array<i64: 1, 8, 32>}, {transform_indices = @transform_2, window_bounds = array<i64: 1, 1, 8>}, {pipeline_mode = #tpu.pipeline_mode<synchronous>, transform_indices = @transform_3, window_bounds = array<i64: 1, 32>}, {pipeline_mode = #tpu.pipeline_mode<synchronous>, transform_indices = @transform_4, window_bounds = array<i64: 1, 32>}, {pipeline_mode = #tpu.pipeline_mode<synchronous>, transform_indices = @transform_5, window_bounds = array<i64: 1, 32>}, {pipeline_mode = #tpu.pipeline_mode<synchronous>, transform_indices = @transform_6, window_bounds = array<i64: 1, 32>}, {pipeline_mode = #tpu.pipeline_mode<synchronous>, transform_indices = @transform_7, window_bounds = array<i64: 32, 32>}, {pipeline_mode = #tpu.pipeline_mode<synchronous>, transform_indices = @transform_8, window_bounds = array<i64: 32, 64>}, {pipeline_mode = #tpu.pipeline_mode<synchronous>, transform_indices = @transform_9, window_bounds = array<i64: 32, 32>}, {pipeline_mode = #tpu.pipeline_mode<synchronous>, transform_indices = @transform_10, window_bounds = array<i64: 1, 32>}, {pipeline_mode = #tpu.pipeline_mode<synchronous>, transform_indices = @transform_11, window_bounds = array<i64: 1, 32>}, {pipeline_mode = #tpu.pipeline_mode<synchronous>, transform_indices = @transform_12, window_bounds = array<i64: 1, 32>}, {pipeline_mode = #tpu.pipeline_mode<synchronous>, transform_indices = @transform_13, window_bounds = array<i64: 32, 64>}, {pipeline_mode = #tpu.pipeline_mode<synchronous>, transform_indices = @transform_14, window_bounds = array<i64: 1, 64>}, {pipeline_mode = #tpu.pipeline_mode<synchronous>, transform_indices = @transform_15, window_bounds = array<i64: 64, 32>}, {pipeline_mode = #tpu.pipeline_mode<synchronous>, transform_indices = @transform_16, window_bounds = array<i64: 1, 32>}, {transform_indices = @transform_17, window_bounds = array<i64: 1, 8, 32>}]} {
    %c0 = arith.constant 0 : index
    %c0_0 = arith.constant 0 : index
    %c0_1 = arith.constant 0 : index
    %0 = vector.load %arg1[%c0, %c0_0, %c0_1] : memref<1x8x32xf32, #tpu.memory_space<vmem>>, vector<1x8x32xf32>
    %1 = vector.shape_cast %0 : vector<1x8x32xf32> to vector<8x32xf32>
    %c0_2 = arith.constant 0 : index
    %c0_3 = arith.constant 0 : index
    %c0_4 = arith.constant 0 : index
    %2 = vector.load %arg2[%c0_2, %c0_3, %c0_4] : memref<1x8x32xf32, #tpu.memory_space<vmem>>, vector<1x8x32xf32>
    %3 = vector.shape_cast %2 : vector<1x8x32xf32> to vector<8x32xf32>
    %c0_5 = arith.constant 0 : index
    %c0_6 = arith.constant 0 : index
    %c0_7 = arith.constant 0 : index
    %4 = vector.load %arg3[%c0_5, %c0_6, %c0_7] : memref<1x1x8xf32, #tpu.memory_space<vmem>>, vector<1x1x8xf32>
    %5 = vector.shape_cast %4 : vector<1x1x8xf32> to vector<1x8xf32>
    %cst = arith.constant 0.000000e+00 : f32
    %6 = vector.broadcast %cst : f32 to vector<1x8xf32>
    %7 = arith.cmpf ogt, %5, %6 : vector<1x8xf32>
    %cst_8 = arith.constant dense<0.000000e+00> : vector<8xf32>
    %8 = vector.multi_reduction <add>, %1, %cst_8 [1] : vector<8x32xf32> to vector<8xf32>
    %9 = vector.shape_cast %8 : vector<8xf32> to vector<8x1xf32>
    %cst_9 = arith.constant 3.200000e+01 : f32
    %10 = vector.broadcast %cst_9 : f32 to vector<8x1xf32>
    %11 = arith.divf %9, %10 : vector<8x1xf32>
    %12 = vector.broadcast %11 : vector<8x1xf32> to vector<8x32xf32>
    %13 = arith.subf %1, %12 : vector<8x32xf32>
    %14 = arith.mulf %13, %13 : vector<8x32xf32>
    %cst_10 = arith.constant dense<0.000000e+00> : vector<8xf32>
    %15 = vector.multi_reduction <add>, %14, %cst_10 [1] : vector<8x32xf32> to vector<8xf32>
    %16 = vector.shape_cast %15 : vector<8xf32> to vector<8x1xf32>
    %cst_11 = arith.constant 3.200000e+01 : f32
    %17 = vector.broadcast %cst_11 : f32 to vector<8x1xf32>
    %18 = arith.divf %16, %17 : vector<8x1xf32>
    %19 = vector.broadcast %11 : vector<8x1xf32> to vector<8x32xf32>
    %20 = arith.subf %1, %19 : vector<8x32xf32>
    %cst_12 = arith.constant 9.99999974E-6 : f32
    %21 = vector.broadcast %cst_12 : f32 to vector<8x1xf32>
    %22 = arith.addf %18, %21 : vector<8x1xf32>
    %23 = math.rsqrt %22 : vector<8x1xf32>
    %24 = vector.broadcast %23 : vector<8x1xf32> to vector<8x32xf32>
    %25 = arith.mulf %20, %24 : vector<8x32xf32>
    %c0_13 = arith.constant 0 : index
    %c0_14 = arith.constant 0 : index
    %26 = vector.load %arg4[%c0_13, %c0_14] : memref<1x32xf32, #tpu.memory_space<vmem>>, vector<1x32xf32>
    %27 = vector.broadcast %26 : vector<1x32xf32> to vector<8x32xf32>
    %28 = arith.mulf %25, %27 : vector<8x32xf32>
    %c0_15 = arith.constant 0 : index
    %c0_16 = arith.constant 0 : index
    %29 = vector.load %arg5[%c0_15, %c0_16] : memref<1x32xf32, #tpu.memory_space<vmem>>, vector<1x32xf32>
    %30 = vector.broadcast %29 : vector<1x32xf32> to vector<8x32xf32>
    %31 = arith.addf %28, %30 : vector<8x32xf32>
    %cst_17 = arith.constant dense<0.000000e+00> : vector<8xf32>
    %32 = vector.multi_reduction <add>, %3, %cst_17 [1] : vector<8x32xf32> to vector<8xf32>
    %33 = vector.shape_cast %32 : vector<8xf32> to vector<8x1xf32>
    %cst_18 = arith.constant 3.200000e+01 : f32
    %34 = vector.broadcast %cst_18 : f32 to vector<8x1xf32>
    %35 = arith.divf %33, %34 : vector<8x1xf32>
    %36 = vector.broadcast %35 : vector<8x1xf32> to vector<8x32xf32>
    %37 = arith.subf %3, %36 : vector<8x32xf32>
    %38 = arith.mulf %37, %37 : vector<8x32xf32>
    %cst_19 = arith.constant dense<0.000000e+00> : vector<8xf32>
    %39 = vector.multi_reduction <add>, %38, %cst_19 [1] : vector<8x32xf32> to vector<8xf32>
    %40 = vector.shape_cast %39 : vector<8xf32> to vector<8x1xf32>
    %cst_20 = arith.constant 3.200000e+01 : f32
    %41 = vector.broadcast %cst_20 : f32 to vector<8x1xf32>
    %42 = arith.divf %40, %41 : vector<8x1xf32>
    %43 = vector.broadcast %35 : vector<8x1xf32> to vector<8x32xf32>
    %44 = arith.subf %3, %43 : vector<8x32xf32>
    %cst_21 = arith.constant 9.99999974E-6 : f32
    %45 = vector.broadcast %cst_21 : f32 to vector<8x1xf32>
    %46 = arith.addf %42, %45 : vector<8x1xf32>
    %47 = math.rsqrt %46 : vector<8x1xf32>
    %48 = vector.broadcast %47 : vector<8x1xf32> to vector<8x32xf32>
    %49 = arith.mulf %44, %48 : vector<8x32xf32>
    %c0_22 = arith.constant 0 : index
    %c0_23 = arith.constant 0 : index
    %50 = vector.load %arg6[%c0_22, %c0_23] : memref<1x32xf32, #tpu.memory_space<vmem>>, vector<1x32xf32>
    %51 = vector.broadcast %50 : vector<1x32xf32> to vector<8x32xf32>
    %52 = arith.mulf %49, %51 : vector<8x32xf32>
    %c0_24 = arith.constant 0 : index
    %c0_25 = arith.constant 0 : index
    %53 = vector.load %arg7[%c0_24, %c0_25] : memref<1x32xf32, #tpu.memory_space<vmem>>, vector<1x32xf32>
    %54 = vector.broadcast %53 : vector<1x32xf32> to vector<8x32xf32>
    %55 = arith.addf %52, %54 : vector<8x32xf32>
    %c0_26 = arith.constant 0 : index
    %c0_27 = arith.constant 0 : index
    %56 = vector.load %arg8[%c0_26, %c0_27] : memref<32x32xf32, #tpu.memory_space<vmem>>, vector<32x32xf32>
    %cst_28 = arith.constant dense<0.000000e+00> : vector<8x32xf32>
    %57 = tpu.matmul %31, %56, %cst_28 {dimension_numbers = #tpu.dot_dimension_numbers<[1], [0], [0], [1], [0, 0, 1, 1], [], []>} : vector<8x32xf32>, vector<32x32xf32>, vector<8x32xf32> -> vector<8x32xf32>
    %c0_29 = arith.constant 0 : index
    %c0_30 = arith.constant 0 : index
    %58 = vector.load %arg9[%c0_29, %c0_30] : memref<32x64xf32, #tpu.memory_space<vmem>>, vector<32x64xf32>
    %cst_31 = arith.constant dense<0.000000e+00> : vector<8x64xf32>
    %59 = tpu.matmul %55, %58, %cst_31 {dimension_numbers = #tpu.dot_dimension_numbers<[1], [0], [0], [1], [0, 0, 1, 1], [], []>} : vector<8x32xf32>, vector<32x64xf32>, vector<8x64xf32> -> vector<8x64xf32>
    %60 = vector.extract_strided_slice %59 {offsets = [0, 0], sizes = [8, 32], strides = [1, 1]} : vector<8x64xf32> to vector<8x32xf32>
    %61 = vector.extract_strided_slice %59 {offsets = [0, 32], sizes = [8, 32], strides = [1, 1]} : vector<8x64xf32> to vector<8x32xf32>
    %c0_32 = arith.constant 0 : index
    %c0_33 = arith.constant 0 : index
    %62 = vector.load %arg10[%c0_32, %c0_33] : memref<32x32xf32, #tpu.memory_space<vmem>>, vector<32x32xf32>
    %63 = vector.extract_strided_slice %57 {offsets = [0, 0], sizes = [8, 16], strides = [1, 1]} : vector<8x32xf32> to vector<8x16xf32>
    %64 = vector.extract_strided_slice %60 {offsets = [0, 0], sizes = [8, 16], strides = [1, 1]} : vector<8x32xf32> to vector<8x16xf32>
    %65 = vector.extract_strided_slice %61 {offsets = [0, 0], sizes = [8, 16], strides = [1, 1]} : vector<8x32xf32> to vector<8x16xf32>
    %cst_34 = arith.constant dense<0.000000e+00> : vector<8x8xf32>
    %66 = tpu.matmul %63, %64, %cst_34 {dimension_numbers = #tpu.dot_dimension_numbers<[1], [1], [0], [0], [0, 0, 1, 0], [], []>} : vector<8x16xf32>, vector<8x16xf32>, vector<8x8xf32> -> vector<8x8xf32>
    %cst_35 = arith.constant 2.500000e-01 : f32
    %67 = vector.broadcast %cst_35 : f32 to vector<8x8xf32>
    %68 = arith.mulf %66, %67 : vector<8x8xf32>
    %cst_36 = arith.constant -1.000000e+30 : f32
    %69 = vector.shape_cast %7 : vector<1x8xi1> to vector<1x8xi1>
    %70 = vector.broadcast %69 : vector<1x8xi1> to vector<8x8xi1>
    %71 = vector.broadcast %cst_36 : f32 to vector<8x8xf32>
    %72 = arith.select %70, %68, %71 : vector<8x8xi1>, vector<8x8xf32>
    %cst_37 = arith.constant dense<0xFF800000> : vector<8xf32>
    %73 = vector.multi_reduction <maximumf>, %72, %cst_37 [1] : vector<8x8xf32> to vector<8xf32>
    %74 = vector.shape_cast %73 : vector<8xf32> to vector<8x1xf32>
    %75 = vector.broadcast %74 : vector<8x1xf32> to vector<8x8xf32>
    %76 = arith.subf %72, %75 : vector<8x8xf32>
    %77 = math.exp %76 : vector<8x8xf32>
    %cst_38 = arith.constant dense<0.000000e+00> : vector<8xf32>
    %78 = vector.multi_reduction <add>, %77, %cst_38 [1] : vector<8x8xf32> to vector<8xf32>
    %79 = vector.shape_cast %78 : vector<8xf32> to vector<8x1xf32>
    %80 = tpu.reciprocal %79 {approx = true} : vector<8x1xf32> -> vector<8x1xf32>
    %81 = vector.broadcast %80 : vector<8x1xf32> to vector<8x8xf32>
    %82 = arith.mulf %77, %81 : vector<8x8xf32>
    %cst_39 = arith.constant dense<0.000000e+00> : vector<8x16xf32>
    %83 = tpu.matmul %82, %65, %cst_39 {dimension_numbers = #tpu.dot_dimension_numbers<[1], [0], [0], [1], [0, 0, 1, 1], [], []>} : vector<8x8xf32>, vector<8x16xf32>, vector<8x16xf32> -> vector<8x16xf32>
    %84 = vector.extract_strided_slice %62 {offsets = [0, 0], sizes = [16, 32], strides = [1, 1]} : vector<32x32xf32> to vector<16x32xf32>
    %cst_40 = arith.constant dense<0.000000e+00> : vector<8x32xf32>
    %85 = tpu.matmul %83, %84, %cst_40 {dimension_numbers = #tpu.dot_dimension_numbers<[1], [0], [0], [1], [0, 0, 1, 1], [], []>} : vector<8x16xf32>, vector<16x32xf32>, vector<8x32xf32> -> vector<8x32xf32>
    %86 = vector.extract_strided_slice %57 {offsets = [0, 16], sizes = [8, 16], strides = [1, 1]} : vector<8x32xf32> to vector<8x16xf32>
    %87 = vector.extract_strided_slice %60 {offsets = [0, 16], sizes = [8, 16], strides = [1, 1]} : vector<8x32xf32> to vector<8x16xf32>
    %88 = vector.extract_strided_slice %61 {offsets = [0, 16], sizes = [8, 16], strides = [1, 1]} : vector<8x32xf32> to vector<8x16xf32>
    %cst_41 = arith.constant dense<0.000000e+00> : vector<8x8xf32>
    %89 = tpu.matmul %86, %87, %cst_41 {dimension_numbers = #tpu.dot_dimension_numbers<[1], [1], [0], [0], [0, 0, 1, 0], [], []>} : vector<8x16xf32>, vector<8x16xf32>, vector<8x8xf32> -> vector<8x8xf32>
    %cst_42 = arith.constant 2.500000e-01 : f32
    %90 = vector.broadcast %cst_42 : f32 to vector<8x8xf32>
    %91 = arith.mulf %89, %90 : vector<8x8xf32>
    %cst_43 = arith.constant -1.000000e+30 : f32
    %92 = vector.shape_cast %7 : vector<1x8xi1> to vector<1x8xi1>
    %93 = vector.broadcast %92 : vector<1x8xi1> to vector<8x8xi1>
    %94 = vector.broadcast %cst_43 : f32 to vector<8x8xf32>
    %95 = arith.select %93, %91, %94 : vector<8x8xi1>, vector<8x8xf32>
    %cst_44 = arith.constant dense<0xFF800000> : vector<8xf32>
    %96 = vector.multi_reduction <maximumf>, %95, %cst_44 [1] : vector<8x8xf32> to vector<8xf32>
    %97 = vector.shape_cast %96 : vector<8xf32> to vector<8x1xf32>
    %98 = vector.broadcast %97 : vector<8x1xf32> to vector<8x8xf32>
    %99 = arith.subf %95, %98 : vector<8x8xf32>
    %100 = math.exp %99 : vector<8x8xf32>
    %cst_45 = arith.constant dense<0.000000e+00> : vector<8xf32>
    %101 = vector.multi_reduction <add>, %100, %cst_45 [1] : vector<8x8xf32> to vector<8xf32>
    %102 = vector.shape_cast %101 : vector<8xf32> to vector<8x1xf32>
    %103 = tpu.reciprocal %102 {approx = true} : vector<8x1xf32> -> vector<8x1xf32>
    %104 = vector.broadcast %103 : vector<8x1xf32> to vector<8x8xf32>
    %105 = arith.mulf %100, %104 : vector<8x8xf32>
    %cst_46 = arith.constant dense<0.000000e+00> : vector<8x16xf32>
    %106 = tpu.matmul %105, %88, %cst_46 {dimension_numbers = #tpu.dot_dimension_numbers<[1], [0], [0], [1], [0, 0, 1, 1], [], []>} : vector<8x8xf32>, vector<8x16xf32>, vector<8x16xf32> -> vector<8x16xf32>
    %107 = vector.extract_strided_slice %62 {offsets = [16, 0], sizes = [16, 32], strides = [1, 1]} : vector<32x32xf32> to vector<16x32xf32>
    %cst_47 = arith.constant dense<0.000000e+00> : vector<8x32xf32>
    %108 = tpu.matmul %106, %107, %cst_47 {dimension_numbers = #tpu.dot_dimension_numbers<[1], [0], [0], [1], [0, 0, 1, 1], [], []>} : vector<8x16xf32>, vector<16x32xf32>, vector<8x32xf32> -> vector<8x32xf32>
    %109 = arith.addf %85, %108 : vector<8x32xf32>
    %c0_48 = arith.constant 0 : index
    %c0_49 = arith.constant 0 : index
    %110 = vector.load %arg11[%c0_48, %c0_49] : memref<1x32xf32, #tpu.memory_space<vmem>>, vector<1x32xf32>
    %111 = vector.broadcast %110 : vector<1x32xf32> to vector<8x32xf32>
    %112 = arith.addf %109, %111 : vector<8x32xf32>
    %cst_50 = arith.constant dense<0.000000e+00> : vector<8xf32>
    %113 = vector.multi_reduction <add>, %112, %cst_50 [1] : vector<8x32xf32> to vector<8xf32>
    %114 = vector.shape_cast %113 : vector<8xf32> to vector<8x1xf32>
    %cst_51 = arith.constant 3.200000e+01 : f32
    %115 = vector.broadcast %cst_51 : f32 to vector<8x1xf32>
    %116 = arith.divf %114, %115 : vector<8x1xf32>
    %117 = vector.broadcast %116 : vector<8x1xf32> to vector<8x32xf32>
    %118 = arith.subf %112, %117 : vector<8x32xf32>
    %119 = arith.mulf %118, %118 : vector<8x32xf32>
    %cst_52 = arith.constant dense<0.000000e+00> : vector<8xf32>
    %120 = vector.multi_reduction <add>, %119, %cst_52 [1] : vector<8x32xf32> to vector<8xf32>
    %121 = vector.shape_cast %120 : vector<8xf32> to vector<8x1xf32>
    %cst_53 = arith.constant 3.200000e+01 : f32
    %122 = vector.broadcast %cst_53 : f32 to vector<8x1xf32>
    %123 = arith.divf %121, %122 : vector<8x1xf32>
    %124 = vector.broadcast %116 : vector<8x1xf32> to vector<8x32xf32>
    %125 = arith.subf %112, %124 : vector<8x32xf32>
    %cst_54 = arith.constant 9.99999974E-6 : f32
    %126 = vector.broadcast %cst_54 : f32 to vector<8x1xf32>
    %127 = arith.addf %123, %126 : vector<8x1xf32>
    %128 = math.rsqrt %127 : vector<8x1xf32>
    %129 = vector.broadcast %128 : vector<8x1xf32> to vector<8x32xf32>
    %130 = arith.mulf %125, %129 : vector<8x32xf32>
    %c0_55 = arith.constant 0 : index
    %c0_56 = arith.constant 0 : index
    %131 = vector.load %arg12[%c0_55, %c0_56] : memref<1x32xf32, #tpu.memory_space<vmem>>, vector<1x32xf32>
    %132 = vector.broadcast %131 : vector<1x32xf32> to vector<8x32xf32>
    %133 = arith.mulf %130, %132 : vector<8x32xf32>
    %c0_57 = arith.constant 0 : index
    %c0_58 = arith.constant 0 : index
    %134 = vector.load %arg13[%c0_57, %c0_58] : memref<1x32xf32, #tpu.memory_space<vmem>>, vector<1x32xf32>
    %135 = vector.broadcast %134 : vector<1x32xf32> to vector<8x32xf32>
    %136 = arith.addf %133, %135 : vector<8x32xf32>
    %c0_59 = arith.constant 0 : index
    %c0_60 = arith.constant 0 : index
    %137 = vector.load %arg14[%c0_59, %c0_60] : memref<32x64xf32, #tpu.memory_space<vmem>>, vector<32x64xf32>
    %cst_61 = arith.constant dense<0.000000e+00> : vector<8x64xf32>
    %138 = tpu.matmul %136, %137, %cst_61 {dimension_numbers = #tpu.dot_dimension_numbers<[1], [0], [0], [1], [0, 0, 1, 1], [], []>} : vector<8x32xf32>, vector<32x64xf32>, vector<8x64xf32> -> vector<8x64xf32>
    %c0_62 = arith.constant 0 : index
    %c0_63 = arith.constant 0 : index
    %139 = vector.load %arg15[%c0_62, %c0_63] : memref<1x64xf32, #tpu.memory_space<vmem>>, vector<1x64xf32>
    %140 = vector.broadcast %139 : vector<1x64xf32> to vector<8x64xf32>
    %141 = arith.addf %138, %140 : vector<8x64xf32>
    %cst_64 = arith.constant 5.000000e-01 : f32
    %142 = vector.broadcast %cst_64 : f32 to vector<8x64xf32>
    %143 = arith.mulf %142, %141 : vector<8x64xf32>
    %cst_65 = arith.constant 4.471500e-02 : f32
    %144 = vector.broadcast %cst_65 : f32 to vector<8x64xf32>
    %145 = arith.mulf %144, %141 : vector<8x64xf32>
    %146 = arith.mulf %145, %141 : vector<8x64xf32>
    %147 = arith.mulf %146, %141 : vector<8x64xf32>
    %148 = arith.addf %141, %147 : vector<8x64xf32>
    %cst_66 = arith.constant 0.797884583 : f32
    %149 = vector.broadcast %cst_66 : f32 to vector<8x64xf32>
    %150 = arith.mulf %149, %148 : vector<8x64xf32>
    %151 = math.tanh %150 : vector<8x64xf32>
    %cst_67 = arith.constant 1.000000e+00 : f32
    %152 = vector.broadcast %cst_67 : f32 to vector<8x64xf32>
    %153 = arith.addf %152, %151 : vector<8x64xf32>
    %154 = arith.mulf %143, %153 : vector<8x64xf32>
    %c0_68 = arith.constant 0 : index
    %c0_69 = arith.constant 0 : index
    %155 = vector.load %arg16[%c0_68, %c0_69] : memref<64x32xf32, #tpu.memory_space<vmem>>, vector<64x32xf32>
    %cst_70 = arith.constant dense<0.000000e+00> : vector<8x32xf32>
    %156 = tpu.matmul %154, %155, %cst_70 {dimension_numbers = #tpu.dot_dimension_numbers<[1], [0], [0], [1], [0, 0, 1, 1], [], []>} : vector<8x64xf32>, vector<64x32xf32>, vector<8x32xf32> -> vector<8x32xf32>
    %c0_71 = arith.constant 0 : index
    %c0_72 = arith.constant 0 : index
    %157 = vector.load %arg17[%c0_71, %c0_72] : memref<1x32xf32, #tpu.memory_space<vmem>>, vector<1x32xf32>
    %158 = vector.broadcast %157 : vector<1x32xf32> to vector<8x32xf32>
    %159 = arith.addf %156, %158 : vector<8x32xf32>
    %160 = arith.addf %159, %112 : vector<8x32xf32>
    %c0_73 = arith.constant 0 : index
    %c0_74 = arith.constant 0 : index
    %c0_75 = arith.constant 0 : index
    %161 = vector.load %arg18[%c0_73, %c0_74, %c0_75] : memref<1x8x32xf32, #tpu.memory_space<vmem>>, vector<1x8x32xf32>
    %162 = vector.shape_cast %161 : vector<1x8x32xf32> to vector<8x32xf32>
    %163 = vector.shape_cast %160 : vector<8x32xf32> to vector<1x8x32xf32>
    tpu.vector_store %arg18[%c0_73, %c0_74, %c0_75], %163 {strides = array<i32>} : memref<1x8x32xf32, #tpu.memory_space<vmem>>, vector<1x8x32xf32>,
    return
  }
  func.func @transform_0(%arg0: i32) -> (i32, i32, i32) {
    %c0_i32 = arith.constant 0 : i32
    %c0_i32_0 = arith.constant 0 : i32
    %c0_i32_1 = arith.constant 0 : i32
    return %arg0, %c0_i32, %c0_i32_0 : i32, i32, i32
  }
  func.func @transform_1(%arg0: i32) -> (i32, i32, i32) {
    %c0_i32 = arith.constant 0 : i32
    %c0_i32_0 = arith.constant 0 : i32
    %c0_i32_1 = arith.constant 0 : i32
    return %arg0, %c0_i32, %c0_i32_0 : i32, i32, i32
  }
  func.func @transform_2(%arg0: i32) -> (i32, i32, i32) {
    %c0_i32 = arith.constant 0 : i32
    %c0_i32_0 = arith.constant 0 : i32
    %c0_i32_1 = arith.constant 0 : i32
    return %arg0, %c0_i32, %c0_i32_0 : i32, i32, i32
  }
  func.func @transform_3(%arg0: i32) -> (i32, i32) {
    %c0_i32 = arith.constant 0 : i32
    %c0_i32_0 = arith.constant 0 : i32
    %c0_i32_1 = arith.constant 0 : i32
    return %c0_i32, %c0_i32_0 : i32, i32
  }
  func.func @transform_4(%arg0: i32) -> (i32, i32) {
    %c0_i32 = arith.constant 0 : i32
    %c0_i32_0 = arith.constant 0 : i32
    %c0_i32_1 = arith.constant 0 : i32
    return %c0_i32, %c0_i32_0 : i32, i32
  }
  func.func @transform_5(%arg0: i32) -> (i32, i32) {
    %c0_i32 = arith.constant 0 : i32
    %c0_i32_0 = arith.constant 0 : i32
    %c0_i32_1 = arith.constant 0 : i32
    return %c0_i32, %c0_i32_0 : i32, i32
  }
  func.func @transform_6(%arg0: i32) -> (i32, i32) {
    %c0_i32 = arith.constant 0 : i32
    %c0_i32_0 = arith.constant 0 : i32
    %c0_i32_1 = arith.constant 0 : i32
    return %c0_i32, %c0_i32_0 : i32, i32
  }
  func.func @transform_7(%arg0: i32) -> (i32, i32) {
    %c0_i32 = arith.constant 0 : i32
    %c0_i32_0 = arith.constant 0 : i32
    %c0_i32_1 = arith.constant 0 : i32
    return %c0_i32, %c0_i32_0 : i32, i32
  }
  func.func @transform_8(%arg0: i32) -> (i32, i32) {
    %c0_i32 = arith.constant 0 : i32
    %c0_i32_0 = arith.constant 0 : i32
    %c0_i32_1 = arith.constant 0 : i32
    return %c0_i32, %c0_i32_0 : i32, i32
  }
  func.func @transform_9(%arg0: i32) -> (i32, i32) {
    %c0_i32 = arith.constant 0 : i32
    %c0_i32_0 = arith.constant 0 : i32
    %c0_i32_1 = arith.constant 0 : i32
    return %c0_i32, %c0_i32_0 : i32, i32
  }
  func.func @transform_10(%arg0: i32) -> (i32, i32) {
    %c0_i32 = arith.constant 0 : i32
    %c0_i32_0 = arith.constant 0 : i32
    %c0_i32_1 = arith.constant 0 : i32
    return %c0_i32, %c0_i32_0 : i32, i32
  }
  func.func @transform_11(%arg0: i32) -> (i32, i32) {
    %c0_i32 = arith.constant 0 : i32
    %c0_i32_0 = arith.constant 0 : i32
    %c0_i32_1 = arith.constant 0 : i32
    return %c0_i32, %c0_i32_0 : i32, i32
  }
  func.func @transform_12(%arg0: i32) -> (i32, i32) {
    %c0_i32 = arith.constant 0 : i32
    %c0_i32_0 = arith.constant 0 : i32
    %c0_i32_1 = arith.constant 0 : i32
    return %c0_i32, %c0_i32_0 : i32, i32
  }
  func.func @transform_13(%arg0: i32) -> (i32, i32) {
    %c0_i32 = arith.constant 0 : i32
    %c0_i32_0 = arith.constant 0 : i32
    %c0_i32_1 = arith.constant 0 : i32
    return %c0_i32, %c0_i32_0 : i32, i32
  }
  func.func @transform_14(%arg0: i32) -> (i32, i32) {
    %c0_i32 = arith.constant 0 : i32
    %c0_i32_0 = arith.constant 0 : i32
    %c0_i32_1 = arith.constant 0 : i32
    return %c0_i32, %c0_i32_0 : i32, i32
  }
  func.func @transform_15(%arg0: i32) -> (i32, i32) {
    %c0_i32 = arith.constant 0 : i32
    %c0_i32_0 = arith.constant 0 : i32
    %c0_i32_1 = arith.constant 0 : i32
    return %c0_i32, %c0_i32_0 : i32, i32
  }
  func.func @transform_16(%arg0: i32) -> (i32, i32) {
    %c0_i32 = arith.constant 0 : i32
    %c0_i32_0 = arith.constant 0 : i32
    %c0_i32_1 = arith.constant 0 : i32
    return %c0_i32, %c0_i32_0 : i32, i32
  }
  func.func @transform_17(%arg0: i32) -> (i32, i32, i32) {
    %c0_i32 = arith.constant 0 : i32
    %c0_i32_0 = arith.constant 0 : i32
    %c0_i32_1 = arith.constant 0 : i32
    return %arg0, %c0_i32, %c0_i32_0 : i32, i32, i32
  }
}

</mosaic_0001>

<bundles_post_ra>
// kernel: tpu_custom_call.1
= control target key start
LH: loop header
LB: loop body
LE: loop exit
PB: predicated region body
PF: predicated region fallthrough
CT: control target
= control target key end

     0   :  { %s1982_s0 = inlined_call_operand.hbm [shape: f32[2,8,32], index: 0, kind: input, shape index: {}]   ;;  %s1983_s1 = inlined_call_operand.hbm [shape: f32[2,8,32], index: 1, kind: input, shape index: {}]   ;;  %s1984_s2 = inlined_call_operand.hbm [shape: f32[2,1,8], index: 2, kind: input, shape index: {}]   ;;  %s1985_s3 = inlined_call_operand.vmem [shape: f32[1,32], index: 3, kind: input, shape index: {}]   ;;  %s1986_s4 = inlined_call_operand.vmem [shape: f32[1,32], index: 4, kind: input, shape index: {}]   ;;  %s1987_s5 = inlined_call_operand.vmem [shape: f32[1,32], index: 5, kind: input, shape index: {}]   ;;  %s1988_s6 = inlined_call_operand.vmem [shape: f32[1,32], index: 6, kind: input, shape index: {}]   ;;  %s1989_s7 = inlined_call_operand.vmem [shape: f32[32,32], index: 7, kind: input, shape index: {}]   ;;  %s1990_s8 = inlined_call_operand.vmem [shape: f32[32,64], index: 8, kind: input, shape index: {}]   ;;  %s1991_s9 = inlined_call_operand.vmem [shape: f32[32,32], index: 9, kind: input, shape index: {}]   ;;  %s1992_s10 = inlined_call_operand.vmem [shape: f32[1,32], index: 10, kind: input, shape index: {}]   ;;  %s1993_s11 = inlined_call_operand.vmem [shape: f32[1,32], index: 11, kind: input, shape index: {}]   ;;  %s1994_s12 = inlined_call_operand.vmem [shape: f32[1,32], index: 12, kind: input, shape index: {}]   ;;  %s1995_s13 = inlined_call_operand.hbm [shape: f32[32,64], index: 13, kind: input, shape index: {}]   ;;  %s1996_s14 = inlined_call_operand.vmem [shape: f32[1,64], index: 14, kind: input, shape index: {}]   ;;  %s1997_s15 = inlined_call_operand.vmem [shape: f32[64,32], index: 15, kind: input, shape index: {}]   ;;  %s1998_s16 = inlined_call_operand.vmem [shape: f32[1,32], index: 16, kind: input, shape index: {}]   ;;  %s1999_s17 = inlined_call_operand.hbm [shape: f32[2,8,32], index: 17, kind: output, shape index: {}]  }
   0x1   :  { %2014 = sst [smem:[#allocation21_spill]] %s1982_s0 }
   0x2   :  { %2015 = sst [smem:[#allocation22_spill]] %s1983_s1 }
   0x3   :  { %2016 = sst [smem:[#allocation23_spill]] %s1986_s4 }
   0x4   :  { %2017 = sst [smem:[#allocation24_spill]] %s1991_s9 }
   0x5   :  { %2018 = sst [smem:[#allocation25_spill]] %s1992_s10 }
   0x6   :  { %2019 = sst [smem:[#allocation26_spill]] %s1993_s11 }
   0x7   :  { %2020 = sst [smem:[#allocation27_spill]] %s1994_s12 }
   0x8   :  { %2021 = sst [smem:[#allocation28_spill]] %s1995_s13 }
   0x9   :  { %2022 = sst [smem:[#allocation29_spill]] %s1996_s14 }
   0xa   :  { %2023 = sst [smem:[#allocation30_spill]] %s1997_s15 }
   0xb   :  { %2024 = sst [smem:[#allocation31_spill]] %s1998_s16 }
   0xc   :  { %2025 = sst [smem:[#allocation32_spill]] %s1999_s17 }
   0xd   :  { %22 = vsyncpa [#allocation3], 0 }
   0xe   :  { %24 = vsyncpa [#allocation3 + $0x1], 0 }
   0xf   :  { %25 = vsyncpa [#allocation6], 0 }
  0x10   :  { %27 = vsyncpa [#allocation6 + $0x1], 0 }
  0x11   :  { %28 = vsyncpa [#allocation9], 0 }
  0x12   :  { %29 = vsyncpa [#allocation4], 0 }
  0x13   :  { %31 = vsyncpa [#allocation4 + $0x1], 0  ;;  %s1645_s24 = smov 0   ;;  %s1647_s25 = smov 0  }
  0x14   :  { %s1649_s26 = smov 0   ;;  %s1651_s27 = smov 0  }
  0x15 LB: > { %2026 = sst [smem:[#allocation15_spill]] %s1533_s24  ;;  %s1666_s28 = sadd.s32 4294967295, %s1545_s27   ;;  %s1545_s27 = sphi %s1651_s27, %s2059_s27   ;;  %s1541_s26 = sphi %s1649_s26, %s2061_s26   ;;  %s1537_s25 = sphi %s1647_s25, %s2063_s25   ;;  %s1533_s24 = sphi %s1645_s24, %s2062_s24  }
  0x16   : > { %2027 = sst [smem:[#allocation16_spill]] %s1541_s26  ;;  %s1221_s29 = sadd.s32 4294967294, %s1545_s27  }
  0x17   : > { %s1670_s0 = sadd.s32 1, %s1545_s27   ;;  %s44_s30 = sadd.s32 1, %s1541_s26 }
  0x18   : > { %2028 = sst [smem:[#allocation17_spill]] %s1670_s0  ;;  %s41_s18 = ssub.s32 %s1545_s27, %s1670_s0 }
  0x19   : > { %p51_p0 = scmp.ne.s32.totalorder %s1541_s26, %s1537_s25  ;;  %p42_p1 = scmp.eq.s32.totalorder %s41_s18, 0 }
  0x1a   : > { %p52_p2 = scmp.eq.s32.totalorder %s1545_s27, 0  ;;  %p57_p3 = scmp.ne.s32.totalorder %s1537_s25, %s1533_s24 }
  0x1b   : > { %p427_p4 = scmp.eq.s32.totalorder %s1666_s28, 1  ;;  %p433_p7 = scmp.eq.s32.totalorder %s1221_s29, 1 }
  0x1c   : > { %s1682_s19 = scalar_select %p42_p1, %s1541_s26, %s44_s30  }
  0x1d   : > { %p53_p5 = por %p52_p2, %p51_p0  ;;  %p1684_p6 = por %p427_p4, %p51_p0 }
  0x1e   : > { %2029 = sst [smem:[#allocation18_spill]] %s1682_s19  ;;  %p1281_p9 = scmp.lt.s32.totalorder %s1545_s27, 2 }
  0x1f   : > { %s2030_s1 = scalar_select %p1684_p6, 1, 0 }
  0x20   : > { %p1693_p10 = por %p433_p7, %p57_p3  ;;  %s1698_s21 = sand.u32 1, %s1541_s26  }
  0x21   : > { %2031 = sst [smem:[#allocation19_spill]] %s2030_s1  ;;  %s2010_s22 = sshll.u32 %s1698_s21, 3 }
  0x22   : > { %s2032_s20 = scalar_select %p1693_p10, 1, 0 }
  0x23   : > { %s1226_s23 = sshll.u32 %s1545_s27, 3  ;;  %p1702_p11 = pnand %p1281_p9, %p53_p5 }
  0x24   : > { %2033 = sst [smem:[#allocation20_spill]] %s2032_s20  ;;  %s525_s29 = sand.u32 1, %s1545_s27  }
  0x25   : > { %s2035_s0 = sld [smem:[#allocation22_spill]]  ;;  %s529_s26 = scalar_lea.vmem [#allocation5], %s2010_s22 }
  0x26   : > { %s537_s20 = sshll.u32 %s529_s26, 4  ;;  %s1714_s16 = scalar_lea.sflag [#allocation6], %s525_s29  ;;  %s538_s20 = int_to_ptr.vmem [resolvable:$true] %s537_s20 }
  0x27   : > { %p1355_p13 = pneg %p1702_p11 }
  0x2b   : > { %s533_s1 = scalar_lea.hbm %s2035_s0, %s1226_s23 }
  0x2c   : > { %s535_s17 = sshll.u32 %s533_s1, 4  ;;  %s1358_s1 = scalar_lea.hbm %s2035_s0, 16  ;;  %s536_s17 = int_to_ptr.hbm [resolvable:$true] %s535_s17 }
  0x2d   : > { %s1351_s14 = sshra.s32 %s536_s17, 4  ;;  %s1352_s14 = int_to_ptr.hbm [resolvable:$true] %s1351_s14 }
  0x2e   : > { %s1353_s15 = scalar_lea.hbm %s1352_s14, 8  ;;  %p1359_p2 = scmp.lt.s32.totalorder %s1352_s14, %s2035_s0 }
  0x2f   : > { %p1354_p12 = scmp.ne.s32.totalorder %s1352_s14, %s1353_s15  ;;  %p1360_p4 = scmp.lt.s32.totalorder %s1358_s1, %s1353_s15 }
  0x31   : > { %p1356_p0 = pnand %p1355_p13, %p1354_p12  ;;  %p1361_p5 = por %p1360_p4, %p1359_p2 }
  0x33   : > { %p1357_p1 = pneg %p1356_p0 }
  0x35   : > { %p1362_p7 = pnand %p1361_p5, %p1357_p1 }
  0x37   : > { %1365 = shalt.err (!%p1362_p7)
}
  0x38   : > { %1272 = dma.hbm_to_vmem [thread:$0]  (!%p1702_p11), %s536_s17, 128, %s538_s20, %s1714_s16  }
  0x39   : > { %p58_p9 = scmp.eq.s32.totalorder %s1666_s28, 0  ;;  %p1222_p12 = scmp.ge.s32.totalorder %s1545_s27, 1 }
  0x3a   : > { %p440_p0 = scmp.lt.s32.totalorder %s1545_s27, 3  ;;  %s2036_s13 = sld [smem:[#allocation28_spill]] }
  0x3b   : > { %p1741_p1 = por %p58_p9, %p57_p3  ;;  %s1547_s17 = smov [#allocation8]  }
  0x3c   : > { %p1745_p2 = pnand %p1222_p12, %p440_p0  ;;  %s483_s20 = sshll.u32 %s1547_s17, 4  ;;  %s484_s20 = int_to_ptr.vmem [resolvable:$true] %s483_s20 }
  0x3d   : > { %s2039_s26 = sld [smem:[#allocation21_spill]]  ;;  %s2041_s0 = sshll.u32 %s1698_s21, 3 }
  0x3e   : > { %p1262_p4 = pneg %p1745_p2  ;;  %s1548_s11 = smov 128  }
  0x3f   : > { %s1549_s10 = smov 8   ;;  %s507_s17 = scalar_lea.sflag [#allocation3], %s1698_s21 }
  0x40   : > { %s481_s22 = sshll.u32 %s2036_s13, 4  ;;  %p1263_p5 = pnand %p1262_p4, %p58_p9  ;;  %s482_s22 = int_to_ptr.hbm [resolvable:$true] %s481_s22 }
  0x41   : > { %s510_s13 = scalar_lea.vmem [#allocation2], %s2041_s0 }
  0x42   : > { %s518_s24 = sshll.u32 %s510_s13, 4  ;;  %s519_s24 = int_to_ptr.vmem [resolvable:$true] %s518_s24 }
  0x43   : > { %s2040_s14 = smov %s2039_s26  ;;  %s514_s15 = scalar_lea.hbm %s2039_s26, %s1226_s23 }
  0x44   : > { %s516_s12 = sshll.u32 %s514_s15, 4  ;;  %s1418_s0 = scalar_lea.hbm %s2040_s14, 16  ;;  %s517_s12 = int_to_ptr.hbm [resolvable:$true] %s516_s12 }
  0x45   : > { %1265 = dma.hbm_to_vmem [thread:$0]  (!%p1263_p5), %s482_s22, 512, %s484_s20, [#allocation9], %s1548_s11, %s1548_s11, %s1549_s10  }
  0x46   : > { %s1411_s9 = sshra.s32 %s517_s12, 4  ;;  %s1412_s9 = int_to_ptr.hbm [resolvable:$true] %s1411_s9 }
  0x47   : > { %s1413_s4 = scalar_lea.hbm %s1412_s9, 8  ;;  %p1419_p0 = scmp.lt.s32.totalorder %s1412_s9, %s2040_s14 }
  0x48   : > { %p1414_p3 = scmp.ne.s32.totalorder %s1412_s9, %s1413_s4  ;;  %p1420_p4 = scmp.lt.s32.totalorder %s1418_s0, %s1413_s4 }
  0x4a   : > { %p1416_p7 = pnand %p1414_p3, %p1355_p13  ;;  %p1421_p5 = por %p1420_p4, %p1419_p0 }
  0x4c   : > { %p1417_p12 = pneg %p1416_p7 }
  0x4e   : > { %p1422_p8 = pnand %p1421_p5, %p1417_p12 }
  0x50   : > { %1425 = shalt.err (!%p1422_p8)
}
  0x51   : > { %1269 = dma.hbm_to_vmem [thread:$0]  (!%p1702_p11), %s517_s12, 128, %s519_s24, %s507_s17  }
  0x52   : > { %s550_s22 = scalar_lea.hbm %s1984_s2, %s1545_s27  ;;  %s547_s26 = scalar_lea.vmem [#allocation7], %s1698_s21 }
  0x53   : > { %s552_s20 = sshll.u32 %s550_s22, 4  ;;  %s554_s15 = sshll.u32 %s547_s26, 4  ;;  %s553_s20 = int_to_ptr.hbm [resolvable:$true] %s552_s20  ;;  %s555_s15 = int_to_ptr.vmem [resolvable:$true] %s554_s15 }
  0x54   : > { %s1441_s9 = sshra.s32 %s553_s20, 4  ;;  %s1448_s12 = scalar_lea.hbm %s1984_s2, 2  ;;  %s1442_s9 = int_to_ptr.hbm [resolvable:$true] %s1441_s9 }
  0x55   : > { %s1443_s4 = scalar_lea.hbm %s1442_s9, 1  ;;  %p1449_p12 = scmp.lt.s32.totalorder %s1442_s9, %s1984_s2 }
  0x56   : > { %p1444_p3 = scmp.ne.s32.totalorder %s1442_s9, %s1443_s4  ;;  %p1450_p0 = scmp.lt.s32.totalorder %s1448_s12, %s1443_s4 }
  0x58   : > { %p1446_p8 = pnand %p1444_p3, %p1355_p13  ;;  %p1451_p4 = por %p1450_p0, %p1449_p12 }
  0x5a   : > { %p1447_p7 = pneg %p1446_p8 }
  0x5c   : > { %p1452_p5 = pnand %p1451_p4, %p1447_p7 }
  0x5e   : > { %1455 = shalt.err (!%p1452_p5)
}
  0x5f   : > { %1275 = dma.hbm_to_vmem [thread:$0]  (!%p1702_p11), %s553_s20, 16, %s555_s15, %s1714_s16  }
  0x60   : > { %563 = sbr.rel (%p1745_p2) target bundleno = 2114 (0x842), region = 88  ;;  %s1792_s21 = sand.u32 (!%p1745_p2), 1, %s1537_s25  }
  0x61   : > { %s1795_s0 = sshll.u32 (!%p1745_p2), %s1792_s21, 3  ;;  %s566_s13 = scalar_lea.sflag (!%p1745_p2), [#allocation3], %s1792_s21 }
  0x62   : > { %s569_s1 = scalar_lea.vmem (!%p1745_p2), [#allocation2], %s1795_s0 }
  0x65   : > { %1516 = dma.done.wait (%p1741_p1), %s566_s13, 128  }
  0x66   : > { %1518 = vsyncadd (%p1741_p1), %s566_s13, 4294967168  ;;  %s575_s16 = sand.u32 1, %s1666_s28   ;;  %s579_s19 = scalar_lea.vmem [#allocation5], %s1795_s0 }
  0x67   : > { %s576_s30 = scalar_lea.sflag [#allocation6], %s575_s16 }
  0x68   : > { %1520 = dma.done.wait (%p1741_p1), %s576_s30, 144  }
  0x69   : > { %1522 = vsyncadd (%p1741_p1), %s576_s30, 4294967152  ;;  %s588_s10 = scalar_lea.vmem [#allocation7], %s1792_s21 }
  0x6a   : > { %1524 = dma.done.wait (%p58_p9), [#allocation9], 512  }
  0x6b   : > { %1526 = vsyncadd (%p58_p9), [#allocation9], 4294966784  ;;  %vm658_vm0 = vcmask 261120   ;;  %v655_v0 = vld [vmem:[%s579_s19] sm:$0xff]  ;;  %v654_v2 = vld [vmem:[%s569_s1] sm:$0xff]  ;;  %v1550_v4 = vmov 32.0  }
  0x6c   : > { %v698_v1 = vsel %vm658_vm0, %v655_v0, 0.0  ;;  %v659_v3 = vsel %vm658_vm0, %v654_v2, 0.0  ;;  %1333 = vrcp.f32 %v1550_v4  ;;  %v760_v21 = vld [vmem:[%s1990_s8 + $0x18] sm:$0xff]  ;;  %v759_v22 = vld [vmem:[%s1990_s8 + $0x10] sm:$0xff]  ;;  %v758_v23 = vld [vmem:[%s1990_s8 + $0x8] sm:$0xff]  ;;  %s2042_s9 = sld [smem:[#allocation23_spill]] }
  0x6d   : > { %699 = vadd.xlane.f32.xlu0 %v698_v1  ;;  %776 = vmatpush.msra.mxu1 %v760_v21  ;;  %v757_v24 = vld [vmem:[%s1990_s8] sm:$0xff]  ;;  %v733_v25 = vld [vmem:[%s1989_s7 + $0x18] sm:$0xff]  ;;  %v732_v26 = vld [vmem:[%s1989_s7 + $0x10] sm:$0xff]  ;;  %vm788_vm8 = vcmask 130048   ;;  %s1551_s4 = smov 96   ;;  %s1552_s18 = smov 112  }
  0x6e   : > { %749 = vmatpush.msra.mxu0 %v733_v25  ;;  %v731_v27 = vld [vmem:[%s1989_s7 + $0x8] sm:$0xff]  ;;  %v730_v30 = vld [vmem:[%s1989_s7] sm:$0xff]  ;;  %s1553_s23 = smov 80   ;;  %v1554_v1 = vmov 0   ;;  %vm820_vm11 = vcmask 64512   ;;  %s2045_s24 = sld [smem:[#allocation24_spill]] }
  0x6f   : > { %777 = vmatpush.msra.mxu1 %v759_v22  ;;  %v1324_v43 = vld [vmem:[%s1987_s5] ss:$0 sm:$0xff]  ;;  %s2047_s20 = sld [smem:[#allocation25_spill]]  ;;  %vm1060_vm15 = vcmask 523264   ;;  %s1247_s1 = sshll.u32 %s1666_s28, 3 }
  0x70   : > { %750 = vmatpush.msra.mxu0 %v732_v26  ;;  %v1325_v47 = vld [vmem:[%s1988_s6] ss:$0 sm:$0xff]  ;;  %s2053_s19 = sld [smem:[#allocation31_spill]]  ;;  %s653_s15 = scalar_lea.vmem [#allocation10], %s1795_s0 }
  0x71   : > { %778 = vmatpush.msra.mxu1 %v758_v23  ;;  %v1326_v53 = vld [vmem:[%s1985_s3] ss:$0 sm:$0xff]  ;;  %s2054_s22 = sld [smem:[#allocation32_spill]]  ;;  %s1087_s28 = scalar_lea.sflag [#allocation4], %s1792_s21 }
  0x72   : > { %v1334_v5 = vpop.eup %1333  ;;  %751 = vmatpush.msra.mxu0 %v731_v27  ;;  %v1327_v56 = vld [vmem:[%s2042_s9] ss:$0 sm:$0xff]  ;;  %s2048_s9 = sld [smem:[#allocation26_spill]] }
  0x73   : > { %v663_v6 = vmul.f32 32.0, %v1334_v5  ;;  %vm667_vm1 = vweird.f32 %v1334_v5  ;;  %779 = vmatpush.msra.mxu1 %v757_v24  ;;  %v656_v63 = vld [vmem:[%s588_s10] sm:$0x1] }
  0x74   : > { %752 = vmatpush.msra.mxu0 %v730_v30  ;;  %vm657_vm9 = vcmp.gt.f32.partialorder %v656_v63, 0.0  ;;  %s2046_s17 = smov %s2045_s24 }
  0x75   : > { %660 = vadd.xlane.f32.xlu0 %v659_v3  ;;  %v664_v7 = vsub.f32 1.0, %v663_v6 }
  0x77   : > { %v665_v8 = vmul.f32 %v1334_v5, %v664_v7  ;;  %s1097_s26 = scalar_lea.hbm %s2054_s22, %s1247_s1  ;;  %s1491_s0 = scalar_lea.hbm %s2054_s22, 16 }
  0x79   : > { %v666_v9 = vadd.f32 %v1334_v5, %v665_v8 }
  0x7b   : > { %v1816_v10 = vsel %vm667_vm1, %v1334_v5, %v666_v9 }
  0xe0   : > { %v700_v11 = vpop.xlane.xlu0 %699 }
  0xe1   : > { %v701_v12 = vmul.f32 %v700_v11, %v1816_v10 }
  0xe3   : > { %v702_v13 = vsub.f32 %v655_v0, %v701_v12 }
  0xe5   : > { %v703_v14 = vmul.f32 %v702_v13, %v702_v13 }
  0xe7   : > { %v704_v15 = vsel %vm658_vm0, %v703_v14, 0.0 }
  0xe8   : > { %705 = vadd.xlane.f32.xlu1 %v704_v15  ;;  %v661_v16 = vpop.xlane.xlu0 %660  ;;  %v785_v15 = vld [vmem:[%s2045_s24 + $0x8] sm:$0xff]  ;;  %s2050_s24 = sld [smem:[#allocation30_spill]] }
  0xe9   : > { %v669_v17 = vmul.f32 %v1816_v10, %v661_v16  ;;  %965 = vmatpush.msrb.mxu1 %v785_v15 }
  0xeb   : > { %v670_v18 = vsub.f32 %v654_v2, %v669_v17  ;;  %v816_v2 = vsel %vm657_vm9, 1, %v1554_v1 }
  0xec   : > { %v817_v3 = vperm.slane %v816_v2, 0 }
  0xed   : > { %v671_v19 = vmul.f32 %v670_v18, %v670_v18 }
  0xee   : > { %vm1868_vm10 = vcmp.eq.s32.totalorder %v817_v3, 1  ;;  %s2051_s13 = smov %s2050_s24  ;;  %v1055_v2 = vld [vmem:[%s2050_s24 + $0x38] sm:$0xff]  ;;  %s2052_s24 = sld [smem:[#allocation29_spill]] }
  0xef   : > { %v672_v20 = vsel %vm658_vm0, %v671_v19, 0.0  ;;  %v1054_v3 = vld [vmem:[%s2051_s13 + $0x30] sm:$0xff]  ;;  %v1052_v5 = vld [vmem:[%s2051_s13 + $0x20] sm:$0xff] }
  0xf0   : > { %673 = vadd.xlane.f32.xlu1 %v672_v20  ;;  %v784_v20 = vld [vmem:[%s2046_s17] sm:$0xff] }
  0xf1   : > { %966 = vmatpush.msrb.mxu1 %v784_v20 }
 0x15b   : > { %v706_v28 = vpop.xlane.xlu1 %705 }
 0x15c   : > { %v707_v29 = vmul.f32 %v706_v28, %v1816_v10 }
 0x15e   : > { %v708_v31 = vadd.f32 1e-05, %v707_v29 }
 0x160   : > { %1335 = vrsqrt.f32 %v708_v31  ;;  %vm715_vm3 = vweird.f32 %v708_v31 }
 0x163   : > { %v674_v32 = vpop.xlane.xlu1 %673 }
 0x164   : > { %v675_v33 = vmul.f32 %v674_v32, %v1816_v10  ;;  %v786_v32 = vld [vmem:[%s2046_s17 + $0x10] sm:$0xff] }
 0x166   : > { %v1336_v34 = vpop.eup %1335  ;;  %v676_v35 = vadd.f32 1e-05, %v675_v33 }
 0x167   : > { %v710_v36 = vmul.f32 %v1336_v34, %v708_v31  ;;  %vm716_vm2 = vweird.f32 %v1336_v34  ;;  %v787_v31 = vld [vmem:[%s2046_s17 + $0x18] sm:$0xff] }
 0x168   : > { %1337 = vrsqrt.f32 %v676_v35  ;;  %vm717_vm4 = vmor %vm715_vm3, %vm716_vm2  ;;  %vm683_vm6 = vweird.f32 %v676_v35 }
 0x169   : > { %v711_v37 = vmul.f32 %v1336_v34, %v710_v36 }
 0x16b   : > { %v712_v38 = vmul.f32 0.5, %v711_v37  ;;  %v1328_v37 = vld [vmem:[%s2047_s20] ss:$0 sm:$0xff] }
 0x16d   : > { %v713_v39 = vsub.f32 1.5, %v712_v38 }
 0x16e   : > { %v1338_v40 = vpop.eup %1337 }
 0x16f   : > { %v714_v41 = vmul.f32 %v1336_v34, %v713_v39  ;;  %v678_v42 = vmul.f32 %v1338_v40, %v676_v35  ;;  %vm684_vm5 = vweird.f32 %v1338_v40 }
 0x170   : > { %vm685_vm7 = vmor %vm683_vm6, %vm684_vm5 }
 0x171   : > { %v718_v44 = vsel %vm717_vm4, %v1336_v34, %v714_v41  ;;  %v679_v45 = vmul.f32 %v1338_v40, %v678_v42 }
 0x172   : > { %v719_v46 = vmul.f32 %v718_v44, %v702_v13 }
 0x173   : > { %v680_v48 = vmul.f32 0.5, %v679_v45 }
 0x174   : > { %v724_v49 = vmul.f32 %v1324_v43, %v719_v46 }
 0x175   : > { %v681_v50 = vsub.f32 1.5, %v680_v48  ;;  %v1011_v48 = vld [vmem:[#allocation8 + $0x18] sm:$0xff] }
 0x176   : > { %v729_v51 = vadd.f32 %v1325_v47, %v724_v49  ;;  %v1010_v49 = vld [vmem:[#allocation8 + $0x10] sm:$0xff] }
 0x177   : > { %v682_v52 = vmul.f32 %v1338_v40, %v681_v50  ;;  %v1009_v50 = vld [vmem:[#allocation8 + $0x8] sm:$0xff] }
 0x178   : > { %1235 = vmatmul.msk.f32.vlgmr.msra.gmra.mxu1 %vm658_vm0, %v729_v51  ;;  %v1008_v51 = vld [vmem:[#allocation8] sm:$0xff] }
 0x179   : > { %v686_v54 = vsel %vm685_vm7, %v1338_v40, %v682_v52 }
 0x17a   : > { %v687_v55 = vmul.f32 %v686_v54, %v670_v18 }
 0x17c   : > { %v692_v57 = vmul.f32 %v1326_v53, %v687_v55 }
 0x17e   : > { %v697_v58 = vadd.f32 %v1327_v56, %v692_v57 }
 0x180   : > { %1234 = vmatmul.msk.f32.vlgmr.msra.gmra.mxu0 %vm658_vm0, %v697_v58 }
 0x1f5   : > { %v781_v59 = vpop.f32.mrf.mxu1 }
 0x1f6   : > { %1236 = vmatpush.xpose.msk.msrb.mxu0 %vm788_vm8, %v781_v59  ;;  %832 = vrot.lane.b32.xlu0 %v781_v59, %s1551_s4  ;;  %s1101_s4 = sshll.u32 %s1097_s26, 4  ;;  %s1102_s4 = int_to_ptr.hbm [resolvable:$true] %s1101_s4 }
 0x1f7   : > { %860 = vrot.lane.b32.xlu1 %v781_v59, %s1552_s18 }
 0x1fa   : > { %942 = vmatpush.msra.mxu0 %v787_v31 }
 0x1fc   : > { %943 = vmatpush.msra.mxu0 %v786_v32 }
 0x1fd   : > { %v754_v60 = vpop.f32.mrf.mxu0 }
 0x1fe   : > { %1237 = vmatmul.msk.f32.vlgmr.msrb.gmra.mxu0 %vm788_vm8, %v754_v60 }
 0x1ff   : > { %899 = vrot.lane.b32.xlu1 %v781_v59, %s1553_s23  ;;  %s2049_s23 = sld [smem:[#allocation27_spill]] }
 0x268   : > { %v833_v61 = vpop.permute.xlu0 %832 }
 0x269   : > { %v861_v62 = vpop.permute.xlu1 %860  ;;  %853 = vmatpush.msra.mxu3 %v833_v61  ;;  %v1329_v61 = vld [vmem:[%s2048_s9] ss:$0 sm:$0xff]  ;;  %s1099_s9 = sshll.u32 %s653_s15, 4  ;;  %s1100_s9 = int_to_ptr.vmem [resolvable:$true] %s1099_s9 }
 0x26b   : > { %1239 = vmatpush.xpose.msk.msrb.mxu3 %vm788_vm8, %v861_v62 }
 0x271   : > { %v900_v0 = vpop.permute.xlu1 %899 }
 0x272   : > { %920 = vmatpush.msra.mxu2 %v900_v0 }
 0x274   : > { %1072 = vmatpush.msrb.mxu2 %v1055_v2 }
 0x276   : > { %1073 = vmatpush.msrb.mxu2 %v1054_v3 }
 0x27b   : > { %v812_v4 = vpop.f32.mrf.mxu0 }
 0x27c   : > { %v815_v6 = vmul.f32 0.25, %v812_v4  ;;  %v1053_v4 = vld [vmem:[%s2051_s13 + $0x28] sm:$0xff] }
 0x27d   : > { %1074 = vmatpush.msrb.mxu2 %v1053_v4 }
 0x27e   : > { %v819_v7 = vsel %vm1868_vm10, %v815_v6, -1e+30  ;;  %v1051_v6 = vld [vmem:[%s2051_s13 + $0x18] sm:$0xff] }
 0x27f   : > { %v821_v8 = vsel %vm820_vm11, %v819_v7, -inf  ;;  %1075 = vmatpush.msrb.mxu2 %v1052_v5 }
 0x280   : > { %822 = vmax.xlane.f32.xlu2 %v821_v8  ;;  %v1049_v8 = vld [vmem:[%s2051_s13 + $0x8] sm:$0xff] }
 0x281   : > { %1076 = vmatpush.msrb.mxu2 %v1051_v6 }
 0x2f3   : > { %v823_v9 = vpop.xlane.xlu2 %822 }
 0x2f4   : > { %v824_v11 = vsub.f32 %v819_v7, %v823_v9  ;;  %v1050_v7 = vld [vmem:[%s2051_s13 + $0x10] sm:$0xff]  ;;  %v1048_v9 = vld [vmem:[%s2051_s13] sm:$0xff] }
 0x2f5   : > { %1077 = vmatpush.msrb.mxu2 %v1050_v7 }
 0x2f6   : > { %v825_v12 = vmul.f32 1.442695, %v824_v11  ;;  %v1331_v11 = vld [vmem:[%s2052_s24] ss:$0 sm:$0xff] }
 0x2f7   : > { %1078 = vmatpush.msrb.mxu2 %v1049_v8 }
 0x2f8   : > { %1339 = vpow2.f32 %v825_v12 }
 0x2f9   : > { %1079 = vmatpush.msrb.mxu2 %v1048_v9 }
 0x2fe   : > { %v1340_v13 = vpop.eup %1339 }
 0x2ff   : > { %v827_v14 = vsel %vm820_vm11, %v1340_v13, 0.0 }
 0x300   : > { %828 = vadd.xlane.f32.xlu2 %v827_v14 }
 0x318   : > { %858 = vrot.lane.b32.xlu2 %v754_v60, %s1552_s18  ;;  %s1485_s18 = sshra.s32 %s1102_s4, 4  ;;  %s1486_s18 = int_to_ptr.hbm [resolvable:$true] %s1485_s18 }
 0x319   : > { %p1492_p1 = scmp.lt.s32.totalorder %s1486_s18, %s2054_s22 }
 0x373   : > { %v829_v16 = vpop.xlane.xlu2 %828 }
 0x374   : > { %1341 = vrcp.f32 %v829_v16 }
 0x37a   : > { %v1342_v17 = vpop.eup %1341 }
 0x37b   : > { %v831_v18 = vmul.f32 %v1342_v17, %v1340_v13  ;;  %v859_v19 = vpop.permute.xlu2 %858 }
 0x37d   : > { %1238 = vmatmul.msk.f32.vlgmr.msra.gmra.mxu3 %vm820_vm11, %v831_v18 }
 0x37e   : > { %1031 = vmatpush.msra.mxu3 %v1011_v48 }
 0x380   : > { %1032 = vmatpush.msra.mxu3 %v1010_v49 }
 0x382   : > { %1033 = vmatpush.msra.mxu3 %v1009_v50 }
 0x384   : > { %1034 = vmatpush.msra.mxu3 %v1008_v51 }
 0x385   : > { %1240 = vmatmul.msk.f32.vlgmr.msrb.gmra.mxu3 %vm788_vm8, %v859_v19 }
 0x400   : > { %v855_v21 = vpop.f32.mrf.mxu3 }
 0x401   : > { %1243 = vmatmul.msk.f32.vlgmr.msrb.gmra.mxu1 %vm788_vm8, %v855_v21 }
 0x408   : > { %v883_v22 = vpop.f32.mrf.mxu3 }
 0x409   : > { %v886_v23 = vmul.f32 0.25, %v883_v22 }
 0x40b   : > { %v887_v24 = vsel %vm1868_vm10, %v886_v23, -1e+30  ;;  %v1332_v23 = vld [vmem:[%s2053_s19] ss:$0 sm:$0xff] }
 0x40c   : > { %v888_v25 = vsel %vm820_vm11, %v887_v24, -inf }
 0x40d   : > { %889 = vmax.xlane.f32.xlu0 %v888_v25 }
 0x47e   : > { %v968_v38 = vpop.f32.mrf.mxu1 }
 0x480   : > { %v890_v26 = vpop.xlane.xlu0 %889 }
 0x481   : > { %v891_v27 = vsub.f32 %v887_v24, %v890_v26 }
 0x483   : > { %v892_v28 = vmul.f32 1.442695, %v891_v27 }
 0x485   : > { %1343 = vpow2.f32 %v892_v28 }
 0x48b   : > { %v1344_v29 = vpop.eup %1343 }
 0x48c   : > { %v894_v30 = vsel %vm820_vm11, %v1344_v29, 0.0 }
 0x48d   : > { %895 = vadd.xlane.f32.xlu2 %v894_v30 }
 0x500   : > { %v896_v33 = vpop.xlane.xlu2 %895 }
 0x501   : > { %1345 = vrcp.f32 %v896_v33 }
 0x507   : > { %v1346_v34 = vpop.eup %1345 }
 0x508   : > { %v898_v35 = vmul.f32 %v1346_v34, %v1344_v29 }
 0x50a   : > { %1241 = vmatmul.msk.f32.vlgmr.msra.gmra.mxu2 %vm820_vm11, %v898_v35 }
 0x58d   : > { %v922_v36 = vpop.f32.mrf.mxu2 }
 0x58e   : > { %1242 = vmatmul.msk.f32.vlgmr.msra.gmra.mxu0 %vm788_vm8, %v922_v36 }
 0x60b   : > { %v945_v39 = vpop.f32.mrf.mxu0 }
 0x60c   : > { %v969_v40 = vadd.f32 %v968_v38, %v945_v39 }
 0x60e   : > { %v1901_v41 = vadd.f32 %v1328_v37, %v969_v40 }
 0x610   : > { %v976_v42 = vsel %vm658_vm0, %v1901_v41, 0.0 }
 0x611   : > { %977 = vadd.xlane.f32.xlu1 %v976_v42 }
 0x684   : > { %v978_v43 = vpop.xlane.xlu1 %977 }
 0x685   : > { %v979_v44 = vmul.f32 %v978_v43, %v1816_v10 }
 0x687   : > { %v980_v45 = vsub.f32 %v1901_v41, %v979_v44 }
 0x689   : > { %v981_v46 = vmul.f32 %v980_v45, %v980_v45 }
 0x68b   : > { %v982_v47 = vsel %vm658_vm0, %v981_v46, 0.0 }
 0x68c   : > { %983 = vadd.xlane.f32.xlu0 %v982_v47 }
 0x6ff   : > { %v984_v52 = vpop.xlane.xlu0 %983 }
 0x700   : > { %v985_v53 = vmul.f32 %v984_v52, %v1816_v10  ;;  %v1330_v10 = vld [vmem:[%s2049_s23] ss:$0 sm:$0xff]  ;;  %s1487_s23 = scalar_lea.hbm %s1486_s18, 8 }
 0x701   : > { %p1488_p11 = scmp.ne.s32.totalorder %s1486_s18, %s1487_s23  ;;  %p1493_p2 = scmp.lt.s32.totalorder %s1491_s0, %s1487_s23 }
 0x702   : > { %v986_v54 = vadd.f32 1e-05, %v985_v53 }
 0x703   : > { %p1489_p13 = pnand %p1488_p11, %p1684_p6  ;;  %p1494_p3 = por %p1493_p2, %p1492_p1 }
 0x704   : > { %1347 = vrsqrt.f32 %v986_v54  ;;  %vm993_vm13 = vweird.f32 %v986_v54 }
 0x705   : > { %p1490_p9 = pneg %p1489_p13 }
 0x707   : > { %p1495_p8 = pnand %p1494_p3, %p1490_p9 }
 0x70a   : > { %v1348_v55 = vpop.eup %1347 }
 0x70b   : > { %v988_v56 = vmul.f32 %v1348_v55, %v986_v54  ;;  %vm994_vm12 = vweird.f32 %v1348_v55 }
 0x70c   : > { %vm995_vm14 = vmor %vm993_vm13, %vm994_vm12 }
 0x70d   : > { %v989_v57 = vmul.f32 %v1348_v55, %v988_v56 }
 0x70f   : > { %v990_v58 = vmul.f32 0.5, %v989_v57 }
 0x711   : > { %v991_v59 = vsub.f32 1.5, %v990_v58 }
 0x713   : > { %v992_v60 = vmul.f32 %v1348_v55, %v991_v59 }
 0x715   : > { %v996_v62 = vsel %vm995_vm14, %v1348_v55, %v992_v60 }
 0x716   : > { %v997_v63 = vmul.f32 %v996_v62, %v980_v45 }
 0x718   : > { %v1002_v0 = vmul.f32 %v1329_v61, %v997_v63 }
 0x71a   : > { %v1007_v1 = vadd.f32 %v1330_v10, %v1002_v0 }
 0x71c   : > { %1244 = vmatmul.msk.f32.vlgmr.msra.gmra.mxu3 %vm658_vm0, %v1007_v1 }
 0x79f   : > { %v1036_v12 = vpop.f32.mrf.mxu3 }
 0x7a0   : > { %v1037_v13 = vadd.f32 %v1331_v11, %v1036_v12 }
 0x7a2   : > { %v1040_v14 = vmul.f32 0.044715, %v1037_v13  ;;  %v1039_v20 = vmul.f32 0.5, %v1037_v13 }
 0x7a4   : > { %v1041_v15 = vmul.f32 %v1040_v14, %v1037_v13 }
 0x7a6   : > { %v1042_v16 = vmul.f32 %v1041_v15, %v1037_v13 }
 0x7a8   : > { %v1043_v17 = vadd.f32 %v1042_v16, %v1037_v13 }
 0x7aa   : > { %v1044_v18 = vmul.f32 0.7978846, %v1043_v17 }
 0x7ac   : > { %1349 = vtanh.f32 %v1044_v18 }
 0x7b2   : > { %v1350_v19 = vpop.eup %1349 }
 0x7b3   : > { %v1046_v21 = vadd.f32 1.0, %v1350_v19 }
 0x7b5   : > { %v1047_v22 = vmul.f32 %v1046_v21, %v1039_v20 }
 0x7b7   : > { %1245 = vmatmul.msk.f32.vlgmr.msrb.gmra.mxu2 %vm1060_vm15, %v1047_v22 }
 0x83a   : > { %v1081_v24 = vpop.f32.mrf.mxu2 }
 0x83b   : > { %v1082_v25 = vadd.f32 %v1332_v23, %v1081_v24 }
 0x83d   : > { %v1084_v26 = vadd.f32 %v1082_v25, %v1901_v41 }
 0x83f   : > { %1085 = vst.msk [vmem:[%s653_s15] sm:$0xff] %vm658_vm0, %v1084_v26 }
 0x840   : > { %1498 = shalt.err (!%p1495_p8)
}
 0x841   : > { %1260 = dma.vmem_to_hbm [thread:$0]  (%p1684_p6), %s1100_s9, 128, %s1102_s4, %s1087_s28  }
 0x842 PF: > { %s2056_s21 = sld [smem:[#allocation15_spill]]  ;;  %p2058_p7 = scmp.ge.s32.totalorder %s1545_s27, 2 }
 0x844   : > { %p1277_p12 = pnand %p2058_p7, %p1693_p10 }
 0x846   : > { %p1278_p0 = pneg %p1277_p12 }
 0x848   : > { %s1113_s30 = sand.u32 1, %s2056_s21  }
 0x849   : > { %s1114_s19 = scalar_lea.sflag [#allocation4], %s1113_s30 }
 0x84a   : > { %1528 = dma.done.wait (%p1278_p0), %s1114_s19, 128  }
 0x84b   : > { %1530 = vsyncadd (%p1278_p0), %s1114_s19, 4294967168  ;;  %s2059_s27 = sld [smem:[#allocation17_spill]]  ;;  %s2062_s24 = smov %s1537_s25 }
 0x84c   : > { %s2060_s29 = sld [smem:[#allocation16_spill]] }
 0x84d   : > { %s2061_s26 = sld [smem:[#allocation18_spill]] }
 0x851   : > { %p34_p4 = scmp.ge.s32.totalorder %s2059_s27, 4  }
 0x852   : > { %s2063_s25 = smov %s2060_s29 }
 0x853   :  { %36 = sbr.rel (!%p34_p4) target bundleno = 21 (0x15), region = 161 }
 0x858   :  { %1120 = vsyncpa [#allocation3], 1 }
 0x859   :  { %1122 = vsyncpa [#allocation3 + $0x1], 1 }
 0x85a   :  { %1123 = vsyncpa [#allocation6], 1 }
 0x85b   :  { %1125 = vsyncpa [#allocation6 + $0x1], 1 }
 0x85c   :  { %1126 = vsyncpa [#allocation9], 1 }
 0x85d   :  { %1127 = vsyncpa [#allocation4], 1 }
 0x85e   :  { %1129 = vsyncpa [#allocation4 + $0x1], 1 }

</bundles_post_ra>
